<compile_context>
chip_gen: v7x
topology: tpu7x:2x2x1
jax: 0.10.0
libtpu: 0.0.40
codegen_flags: <defaults>
</compile_context>

<pallas_src>
import functools

import jax
import jax.numpy as jnp
from jax.experimental import pallas as pl
from jax.experimental.pallas import tpu as pltpu

LANE = 128        # vreg lane width
BF16_SUBLANE = 16 # bf16 packs 16 rows per sublane group


def _round_up(x, m):
    return (x + m - 1) // m * m


def _cdiv(a, b):
    return (a + b - 1) // b


def mlp_kernel(x_ref, w1_ref, b1_ref, w2_ref, b2_ref, o_ref):
    # x tile: [TB, in_p] bf16 (cast + padded once in the wrapper).
    # Weights: bf16, pre-transposed to [in, out], zero-padded to 128-multiples.
    # Biases: [1, dim] f32. Epilogue (bias add, ReLU) stays in f32.
    h = jnp.dot(x_ref[...], w1_ref[...], preferred_element_type=jnp.float32)
    h = jnp.maximum(h + b1_ref[...], 0.0)
    o = jnp.dot(h.astype(jnp.bfloat16), w2_ref[...],
                preferred_element_type=jnp.float32)
    o_ref[...] = (o + b2_ref[...]).astype(o_ref.dtype)


def prepare_params(w1, b1, w2, b2):
    """One-time param prep (NOT in the per-call hot path).

    Inputs use the PyTorch nn.Linear layout:
      w1: [hidden, in], b1: [hidden], w2: [out, hidden], b2: [out].
    Returns bf16 weights transposed to [in, out] and zero-padded so every
    feature dim is a multiple of 128, plus f32 row-vector biases.
    """
    hidden_dim, in_dim = w1.shape
    out_dim = w2.shape[0]
    in_p = _round_up(in_dim, LANE)
    hid_p = _round_up(hidden_dim, LANE)
    out_p = _round_up(out_dim, LANE)

    w1_t = jnp.zeros((in_p, hid_p), jnp.bfloat16)
    w1_t = w1_t.at[:in_dim, :hidden_dim].set(jnp.transpose(w1).astype(jnp.bfloat16))
    w2_t = jnp.zeros((hid_p, out_p), jnp.bfloat16)
    w2_t = w2_t.at[:hidden_dim, :out_dim].set(jnp.transpose(w2).astype(jnp.bfloat16))
    b1_r = jnp.zeros((1, hid_p), jnp.float32).at[:, :hidden_dim].set(
        b1.astype(jnp.float32))
    b2_r = jnp.zeros((1, out_p), jnp.float32).at[:, :out_dim].set(
        b2.astype(jnp.float32))
    dims = (in_dim, hidden_dim, out_dim)
    return (w1_t, b1_r, w2_t, b2_r), dims


def _choose_batch_tile(B):
    """Pick the batch tile: >=2 grid steps when possible (v7x megacore),
    minimal padding waste, capped at 512 rows, multiple of 16 (bf16)."""
    cap = 512
    n_tiles = max(2, _cdiv(B, cap))
    tb = _round_up(_cdiv(B, n_tiles), BF16_SUBLANE)
    return min(max(tb, BF16_SUBLANE), cap)


@functools.partial(jax.jit, static_argnames=("dims",))
def network_forward(x, prepared, dims):
    """x: [B, in_dim] f32.  Matches PyTorch: output(relu(hidden(x)))."""
    w1_t, b1_r, w2_t, b2_r = prepared
    in_dim, _, out_dim = dims
    B = x.shape[0]
    in_p, hid_p = w1_t.shape
    out_p = w2_t.shape[1]

    TB = _choose_batch_tile(B)
    B_p = _round_up(B, TB)
    n_tiles = B_p // TB

    # Cast to bf16 in the wrapper (halves the x DMA bytes); skip the padding
    # round-trip entirely when dims are already aligned.
    if B_p == B and in_p == in_dim:
        x_p = x.astype(jnp.bfloat16)
    else:
        x_p = jnp.zeros((B_p, in_p), jnp.bfloat16).at[:B, :in_dim].set(
            x.astype(jnp.bfloat16))

    # Real VMEM footprint (+50% headroom), capped so it stays legal on v7x.
    weight_bytes = (in_p * hid_p + hid_p * out_p) * 2          # bf16, single-buffered
    bias_bytes = 8 * (hid_p + out_p) * 4                       # f32, sublane-padded
    act_bytes = 2 * TB * in_p * 2                              # x tile, double-buffered
    out_bytes = 2 * TB * out_p * 4                             # out tile, double-buffered
    tmp_bytes = TB * hid_p * (4 + 2)                           # h (f32 + bf16 copy)
    vmem_need = weight_bytes + bias_bytes + act_bytes + out_bytes + tmp_bytes
    vmem_limit = min(max(int(vmem_need * 1.5) + (2 << 20), 32 << 20), 64 << 20)

    cost = pl.CostEstimate(
        flops=2 * B_p * (in_p * hid_p + hid_p * out_p),
        transcendentals=0,
        bytes_accessed=(B_p * in_p * 2 + weight_bytes
                        + (hid_p + out_p) * 4 + B_p * out_p * 4),
    )

    resident = dict(pipeline_mode=pl.Buffered(1))  # constant index_map -> no double-buffer

    out_arr = pl.pallas_call(
        mlp_kernel,
        out_shape=jax.ShapeDtypeStruct((B_p, out_p), jnp.float32),
        grid_spec=pltpu.PrefetchScalarGridSpec(
            num_scalar_prefetch=0,
            grid=(n_tiles,),
            in_specs=[
                pl.BlockSpec((TB, in_p), lambda i: (i, 0)),                 # x: tiled on batch
                pl.BlockSpec((in_p, hid_p), lambda i: (0, 0), **resident),  # W1: resident
                pl.BlockSpec((1, hid_p), lambda i: (0, 0), **resident),     # b1: resident
                pl.BlockSpec((hid_p, out_p), lambda i: (0, 0), **resident), # W2: resident
                pl.BlockSpec((1, out_p), lambda i: (0, 0), **resident),     # b2: resident
            ],
            out_specs=pl.BlockSpec((TB, out_p), lambda i: (i, 0)),
        ),
        compiler_params=pltpu.CompilerParams(
            # Batch axis is independent -> shard across both TCs on v7x.
            dimension_semantics=("parallel",),
            vmem_limit_bytes=vmem_limit,
        ),
        cost_estimate=cost,
    )(x_p, w1_t, b1_r, w2_t, b2_r)

    if B_p == B and out_p == out_dim:
        return out_arr
    return out_arr[:B, :out_dim]


def init_params(key, input_dim, hidden_dim, output_dim):
    # Deterministic init mirroring nn.Linear default: U(-1/sqrt(fan_in), 1/sqrt(fan_in))
    k1, k2, k3, k4 = jax.random.split(key, 4)
    bound1 = 1.0 / jnp.sqrt(input_dim)
    bound2 = 1.0 / jnp.sqrt(hidden_dim)
    w1 = jax.random.uniform(k1, (hidden_dim, input_dim), jnp.float32, -bound1, bound1)
    b1 = jax.random.uniform(k2, (hidden_dim,), jnp.float32, -bound1, bound1)
    w2 = jax.random.uniform(k3, (output_dim, hidden_dim), jnp.float32, -bound2, bound2)
    b2 = jax.random.uniform(k4, (output_dim,), jnp.float32, -bound2, bound2)
    return w1, b1, w2, b2


if __name__ == "__main__":
    batch, input_dim, hidden_dim, output_dim = 8, 32, 64, 16

    key = jax.random.PRNGKey(0)
    kx, kp = jax.random.split(key)
    x = jax.random.normal(kx, (batch, input_dim), jnp.float32)
    w1, b1, w2, b2 = init_params(kp, input_dim, hidden_dim, output_dim)

    prepared, dims = prepare_params(w1, b1, w2, b2)   # one-time weight prep
    out = network_forward(x, prepared, dims)
    jax.block_until_ready(out)

    # Reference check in plain f32 JAX (same math as the PyTorch forward).
    ref = jnp.maximum(x @ w1.T + b1, 0.0) @ w2.T + b2
    assert out.shape == (batch, output_dim)
    # bf16 MXU operands -> relaxed tolerance vs. the f32 reference.
    assert jnp.allclose(out, ref, atol=5e-2, rtol=5e-2)

    print("KERNEL_OK")
</pallas_src>

<mosaic_0001>
module attributes {stable_mosaic.version = 11 : i64} {
  func.func @mlp_kernel(%arg0: i32, %arg1: memref<16x128xbf16, #tpu.memory_space<vmem>>, %arg2: memref<128x128xbf16, #tpu.memory_space<vmem>>, %arg3: memref<1x128xf32, #tpu.memory_space<vmem>>, %arg4: memref<128x128xbf16, #tpu.memory_space<vmem>>, %arg5: memref<1x128xf32, #tpu.memory_space<vmem>>, %arg6: memref<16x128xf32, #tpu.memory_space<vmem>>) attributes {dimension_semantics = [#tpu.dimension_semantics<parallel>], iteration_bounds = array<i64: 1>, scalar_prefetch = 0 : i64, scratch_operands = 0 : i64, tpu.core_type = #tpu.core_type<tc>, window_params = [{transform_indices = @transform_0, window_bounds = array<i64: 16, 128>}, {pipeline_mode = #tpu.pipeline_mode<synchronous>, transform_indices = @transform_1, window_bounds = array<i64: 128, 128>}, {pipeline_mode = #tpu.pipeline_mode<synchronous>, transform_indices = @transform_2, window_bounds = array<i64: 1, 128>}, {pipeline_mode = #tpu.pipeline_mode<synchronous>, transform_indices = @transform_3, window_bounds = array<i64: 128, 128>}, {pipeline_mode = #tpu.pipeline_mode<synchronous>, transform_indices = @transform_4, window_bounds = array<i64: 1, 128>}, {transform_indices = @transform_5, window_bounds = array<i64: 16, 128>}]} {
    %c0 = arith.constant 0 : index
    %c0_0 = arith.constant 0 : index
    %0 = vector.load %arg1[%c0, %c0_0] : memref<16x128xbf16, #tpu.memory_space<vmem>>, vector<16x128xbf16>
    %c0_1 = arith.constant 0 : index
    %c0_2 = arith.constant 0 : index
    %1 = vector.load %arg2[%c0_1, %c0_2] : memref<128x128xbf16, #tpu.memory_space<vmem>>, vector<128x128xbf16>
    %cst = arith.constant dense<0.000000e+00> : vector<16x128xf32>
    %2 = tpu.matmul %0, %1, %cst {dimension_numbers = #tpu.dot_dimension_numbers<[1], [0], [0], [1], [0, 0, 1, 1], [], []>} : vector<16x128xbf16>, vector<128x128xbf16>, vector<16x128xf32> -> vector<16x128xf32>
    %c0_3 = arith.constant 0 : index
    %c0_4 = arith.constant 0 : index
    %3 = vector.load %arg3[%c0_3, %c0_4] : memref<1x128xf32, #tpu.memory_space<vmem>>, vector<1x128xf32>
    %4 = vector.broadcast %3 : vector<1x128xf32> to vector<16x128xf32>
    %5 = arith.addf %2, %4 : vector<16x128xf32>
    %cst_5 = arith.constant 0.000000e+00 : f32
    %6 = vector.broadcast %cst_5 : f32 to vector<16x128xf32>
    %7 = arith.maximumf %5, %6 : vector<16x128xf32>
    %8 = arith.truncf %7 : vector<16x128xf32> to vector<16x128xbf16>
    %c0_6 = arith.constant 0 : index
    %c0_7 = arith.constant 0 : index
    %9 = vector.load %arg4[%c0_6, %c0_7] : memref<128x128xbf16, #tpu.memory_space<vmem>>, vector<128x128xbf16>
    %cst_8 = arith.constant dense<0.000000e+00> : vector<16x128xf32>
    %10 = tpu.matmul %8, %9, %cst_8 {dimension_numbers = #tpu.dot_dimension_numbers<[1], [0], [0], [1], [0, 0, 1, 1], [], []>} : vector<16x128xbf16>, vector<128x128xbf16>, vector<16x128xf32> -> vector<16x128xf32>
    %c0_9 = arith.constant 0 : index
    %c0_10 = arith.constant 0 : index
    %11 = vector.load %arg5[%c0_9, %c0_10] : memref<1x128xf32, #tpu.memory_space<vmem>>, vector<1x128xf32>
    %12 = vector.broadcast %11 : vector<1x128xf32> to vector<16x128xf32>
    %13 = arith.addf %10, %12 : vector<16x128xf32>
    %c0_11 = arith.constant 0 : index
    %c0_12 = arith.constant 0 : index
    %14 = vector.load %arg6[%c0_11, %c0_12] : memref<16x128xf32, #tpu.memory_space<vmem>>, vector<16x128xf32>
    tpu.vector_store %arg6[%c0_11, %c0_12], %13 {strides = array<i32>} : memref<16x128xf32, #tpu.memory_space<vmem>>, vector<16x128xf32>,
    return
  }
  func.func @transform_0(%arg0: i32) -> (i32, i32) {
    %c0_i32 = arith.constant 0 : i32
    %c0_i32_0 = arith.constant 0 : i32
    return %arg0, %c0_i32 : i32, i32
  }
  func.func @transform_1(%arg0: i32) -> (i32, i32) {
    %c0_i32 = arith.constant 0 : i32
    %c0_i32_0 = arith.constant 0 : i32
    %c0_i32_1 = arith.constant 0 : i32
    return %c0_i32, %c0_i32_0 : i32, i32
  }
  func.func @transform_2(%arg0: i32) -> (i32, i32) {
    %c0_i32 = arith.constant 0 : i32
    %c0_i32_0 = arith.constant 0 : i32
    %c0_i32_1 = arith.constant 0 : i32
    return %c0_i32, %c0_i32_0 : i32, i32
  }
  func.func @transform_3(%arg0: i32) -> (i32, i32) {
    %c0_i32 = arith.constant 0 : i32
    %c0_i32_0 = arith.constant 0 : i32
    %c0_i32_1 = arith.constant 0 : i32
    return %c0_i32, %c0_i32_0 : i32, i32
  }
  func.func @transform_4(%arg0: i32) -> (i32, i32) {
    %c0_i32 = arith.constant 0 : i32
    %c0_i32_0 = arith.constant 0 : i32
    %c0_i32_1 = arith.constant 0 : i32
    return %c0_i32, %c0_i32_0 : i32, i32
  }
  func.func @transform_5(%arg0: i32) -> (i32, i32) {
    %c0_i32 = arith.constant 0 : i32
    %c0_i32_0 = arith.constant 0 : i32
    return %arg0, %c0_i32 : i32, i32
  }
}

</mosaic_0001>

<bundles_post_ra>
// kernel: network_forward.1
= control target key start
LH: loop header
LB: loop body
LE: loop exit
PB: predicated region body
PF: predicated region fallthrough
CT: control target
= control target key end

     0   :  { %10 = vsyncpa [#allocation3], 0  ;;  %s515_s0 = inlined_call_operand.vmem [shape: bf16[16,128], index: 0, kind: input, shape index: {}]   ;;  %s516_s1 = inlined_call_operand.hbm [shape: bf16[128,128], index: 1, kind: input, shape index: {}]   ;;  %s517_s2 = inlined_call_operand.vmem [shape: f32[1,128], index: 2, kind: input, shape index: {}]   ;;  %s518_s3 = inlined_call_operand.hbm [shape: bf16[128,128], index: 3, kind: input, shape index: {}]   ;;  %s519_s4 = inlined_call_operand.vmem [shape: f32[1,128], index: 4, kind: input, shape index: {}]   ;;  %s520_s5 = inlined_call_operand.vmem [shape: f32[16,128], index: 5, kind: output, shape index: {}]  }
   0x1   :  { %11 = vsyncpa [#allocation5], 0  ;;  %s440_s18 = smov [#allocation2]   ;;  %s392_s22 = scalar_lea.hbm %s516_s1, 1024 }
   0x2   :  { %s19_s19 = sshll.u32 %s440_s18, 4  ;;  %p393_p0 = scmp.ne.s32.totalorder %s516_s1, %s392_s22  ;;  %s20_s19 = int_to_ptr.vmem [resolvable:$true] %s19_s19 }
   0x3   :  { %p396_p1 = scmp.lt.u32.totalorder %s392_s22, %s516_s1 }
   0x5   :  { %p398_p2 = pnand %p396_p1, %p393_p0 }
   0x7   :  { %401 = shalt.err (!%p398_p2)
}
   0x8   :  { %s402_s27 = scalar_lea.vmem %s20_s19, 1024  ;;  %p407_p4 = scmp.lt.s32.totalorder %s20_s19, %s20_s19 }
   0x9   :  { %p403_p3 = scmp.ne.s32.totalorder %s20_s19, %s402_s27  ;;  %p408_p5 = scmp.lt.s32.totalorder %s402_s27, %s402_s27 }
   0xb   :  { %p409_p6 = por %p408_p5, %p407_p4 }
   0xd   :  { %p410_p7 = pnand %p409_p6, %p403_p3 }
   0xf   :  { %413 = shalt.err (!%p410_p7)
}
  0x10   :  { %s441_s28 = smov 64   ;;  %s442_s29 = smov 4  }
  0x11   :  { %25 = dma.hbm_to_vmem [thread:$0]  %s516_s1, 1024, %s20_s19, [#allocation3], %s441_s28, %s441_s28, %s442_s29  }
  0x12   :  { %s443_s7 = smov [#allocation4]   ;;  %s414_s11 = scalar_lea.hbm %s518_s3, 1024 }
  0x13   :  { %s33_s8 = sshll.u32 %s443_s7, 4  ;;  %p415_p8 = scmp.ne.s32.totalorder %s518_s3, %s414_s11  ;;  %s34_s8 = int_to_ptr.vmem [resolvable:$true] %s33_s8 }
  0x14   :  { %p418_p9 = scmp.lt.u32.totalorder %s414_s11, %s518_s3 }
  0x16   :  { %p420_p10 = pnand %p418_p9, %p415_p8 }
  0x18   :  { %423 = shalt.err (!%p420_p10)
}
  0x19   :  { %s424_s16 = scalar_lea.vmem %s34_s8, 1024  ;;  %p429_p12 = scmp.lt.s32.totalorder %s34_s8, %s34_s8 }
  0x1a   :  { %p425_p11 = scmp.ne.s32.totalorder %s34_s8, %s424_s16  ;;  %p430_p13 = scmp.lt.s32.totalorder %s424_s16, %s424_s16 }
  0x1c   :  { %p431_p0 = por %p430_p13, %p429_p12 }
  0x1e   :  { %p432_p1 = pnand %p431_p0, %p425_p11 }
  0x20   :  { %435 = shalt.err (!%p432_p1)
}
  0x21   :  { %39 = dma.hbm_to_vmem [thread:$0]  %s518_s3, 1024, %s34_s8, [#allocation5], %s441_s28, %s441_s28, %s442_s29  }
  0x22   :  { %436 = dma.done.wait [#allocation3], 1024  }
  0x23   :  { %437 = vsyncadd [#allocation3], 4294966272 }
  0x24   :  { %438 = dma.done.wait [#allocation5], 1024  }
  0x25   :  { %439 = vsyncadd [#allocation5], 4294966272  ;;  %v444_v0 = vmov 0.0   ;;  %vm445_vm0 = vmmov 0   ;;  %v375_v1 = vld [vmem:[#allocation2] sm:$0xff]   ;;  %v376_v2 = vld [vmem:[#allocation2 + $0x8] sm:$0xff]  }
  0x26   :  { %329 = vmatprep.subr.bf16.mxu0 %v444_v0  ;;  %345 = vmatprep.mubr.msk.bf16.mxu0 %vm445_vm0, %v444_v0  ;;  %v377_v3 = vld [vmem:[#allocation2 + $0x10] sm:$0xff]   ;;  %v384_v4 = vld [vmem:[#allocation4] sm:$0xff]   ;;  %v378_v5 = vld [vmem:[#allocation2 + $0x18] sm:$0xff]  }
  0x27   :  { %349 = vmatprep.subr.bf16.mxu1 %v444_v0  ;;  %365 = vmatprep.mubr.msk.bf16.mxu1 %vm445_vm0, %v444_v0  ;;  %v385_v6 = vld [vmem:[#allocation4 + $0x8] sm:$0xff]   ;;  %v379_v7 = vld [vmem:[#allocation2 + $0x20] sm:$0xff]   ;;  %v386_v8 = vld [vmem:[#allocation4 + $0x10] sm:$0xff]  }
  0x28   :  { %330 = vmatpush3.bf16.msra.mxu0 %v375_v1  ;;  %350 = vmatpush3.bf16.msra.mxu1 %v384_v4  ;;  %v380_v9 = vld [vmem:[#allocation2 + $0x28] sm:$0xff]   ;;  %v387_v10 = vld [vmem:[#allocation4 + $0x18] sm:$0xff]   ;;  %v381_v11 = vld [vmem:[#allocation2 + $0x30] sm:$0xff]  }
  0x29   :  { %331 = vmatprep.subr.bf16.mxu0 %v444_v0  ;;  %351 = vmatprep.subr.bf16.mxu1 %v444_v0  ;;  %v388_v12 = vld [vmem:[#allocation4 + $0x20] sm:$0xff]   ;;  %v382_v13 = vld [vmem:[#allocation2 + $0x38] sm:$0xff]   ;;  %v389_v14 = vld [vmem:[#allocation4 + $0x28] sm:$0xff]  }
  0x2a   :  { %v383_v15 = vld [vmem:[%s515_s0] sm:$0xff]   ;;  %v390_v16 = vld [vmem:[#allocation4 + $0x30] sm:$0xff]   ;;  %v391_v17 = vld [vmem:[#allocation4 + $0x38] sm:$0xff]  }
  0x2b   :  { %v292_v18 = vld [vmem:[%s517_s2] ss:$0 sm:$0xff] }
  0x2c   :  { %332 = vmatpush3.bf16.msra.mxu0 %v376_v2  ;;  %352 = vmatpush3.bf16.msra.mxu1 %v385_v6  ;;  %v302_v28 = vld [vmem:[%s519_s4] ss:$0 sm:$0xff] }
  0x2d   :  { %333 = vmatprep.subr.bf16.mxu0 %v444_v0  ;;  %353 = vmatprep.subr.bf16.mxu1 %v444_v0 }
  0x30   :  { %334 = vmatpush3.bf16.msra.mxu0 %v377_v3  ;;  %354 = vmatpush3.bf16.msra.mxu1 %v386_v8 }
  0x31   :  { %335 = vmatprep.subr.bf16.mxu0 %v444_v0  ;;  %355 = vmatprep.subr.bf16.mxu1 %v444_v0 }
  0x34   :  { %336 = vmatpush3.bf16.msra.mxu0 %v378_v5  ;;  %356 = vmatpush3.bf16.msra.mxu1 %v387_v10 }
  0x35   :  { %337 = vmatprep.subr.bf16.mxu0 %v444_v0  ;;  %357 = vmatprep.subr.bf16.mxu1 %v444_v0 }
  0x38   :  { %338 = vmatpush3.bf16.msra.mxu0 %v379_v7  ;;  %358 = vmatpush3.bf16.msra.mxu1 %v388_v12 }
  0x39   :  { %339 = vmatprep.subr.bf16.mxu0 %v444_v0  ;;  %359 = vmatprep.subr.bf16.mxu1 %v444_v0 }
  0x3c   :  { %340 = vmatpush3.bf16.msra.mxu0 %v380_v9  ;;  %360 = vmatpush3.bf16.msra.mxu1 %v389_v14 }
  0x3d   :  { %341 = vmatprep.subr.bf16.mxu0 %v444_v0  ;;  %361 = vmatprep.subr.bf16.mxu1 %v444_v0 }
  0x40   :  { %342 = vmatpush3.bf16.msra.mxu0 %v381_v11  ;;  %362 = vmatpush3.bf16.msra.mxu1 %v390_v16 }
  0x41   :  { %343 = vmatprep.subr.bf16.mxu0 %v444_v0  ;;  %363 = vmatprep.subr.bf16.mxu1 %v444_v0 }
  0x44   :  { %344 = vmatpush3.bf16.msra.mxu0 %v382_v13  ;;  %364 = vmatpush3.bf16.msra.mxu1 %v391_v17 }
  0x47   :  { %346 = vmatmul.mubr.bf16.vlgmr.msra.gmra.mrb[0].mxu0 %v383_v15 }
 0x11a   :  { %v162_v19 = vpop.f32.mrb[0].mxu0 }
 0x11b   :  { %v163_v20 = vadd.f32 %v292_v18, %v162_v19  ;;  %v347_v21 = vpop.f32.mrb[1].mxu0 }
 0x11c   :  { %v165_v22 = vpop.f32.mrb[2].mxu0 }
 0x11d   :  { %v166_v23 = vadd.f32 %v292_v18, %v165_v22  ;;  %v348_v24 = vpop.f32.mrb[3].mxu0  ;;  %v169_v25 = vmax.f32 %v163_v20, 0.0 }
 0x11f   :  { %v170_v26 = vmax.f32 %v166_v23, 0.0 }
 0x121   :  { %v171_v27 = vpack.c.bf16 %v170_v26, %v169_v25 }
 0x123   :  { %366 = vmatmul.mubr.bf16.vlgmr.msra.gmra.mrb[0].mxu1 %v171_v27 }
 0x1f6   :  { %v277_v29 = vpop.f32.mrb[0].mxu1 }
 0x1f7   :  { %v278_v30 = vadd.f32 %v302_v28, %v277_v29  ;;  %v367_v31 = vpop.f32.mrb[1].mxu1 }
 0x1f8   :  { %v280_v32 = vpop.f32.mrb[2].mxu1 }
 0x1f9   :  { %284 = vst [vmem:[%s520_s5] sm:$0xff] %v278_v30  ;;  %v281_v33 = vadd.f32 %v302_v28, %v280_v32  ;;  %v368_v34 = vpop.f32.mrb[3].mxu1 }
 0x1fb   :  { %285 = vst [vmem:[%s520_s5 + $0x8] sm:$0xff] %v281_v33 }
 0x1fc   :  { %290 = vsyncpa [#allocation3], 1 }
 0x1fd   :  { %291 = vsyncpa [#allocation5], 1 }

</bundles_post_ra>
